<compile_context>
chip_gen: v7x
topology: tpu7x:2x2x1
jax: 0.10.0
libtpu: 0.0.40
codegen_flags: <defaults>
</compile_context>

<pallas_src>
import functools

import jax
import jax.numpy as jnp
from jax.experimental import pallas as pl
from jax.experimental.pallas import tpu as pltpu


def _round_up(x, m):
    return ((x + m - 1) // m) * m


def _gather_kernel(ids_ref, tab_ref, out_ref):
    """out_ref[r, :] = tab_ref[ids[base + r], :] for r in [0, bn)."""
    # ids_ref: (n_pad,) int32 in SMEM (scalar-prefetched)
    # tab_ref: (num_rows, E) table, resident in VMEM
    # out_ref: (bn, E) output block for this grid step
    bn = out_ref.shape[0]
    base = pl.program_id(0) * bn

    @pl.loop(0, bn)
    def _(r):
        row = ids_ref[base + r]                       # scalar read from SMEM
        out_ref[pl.ds(r, 1), :] = tab_ref[pl.ds(row, 1), :]


@functools.partial(jax.jit, static_argnames=("block_n",))
def embed_lookup(table, nids, block_n=256):
    """Gather rows of `table` at `nids` with a single Pallas launch."""
    N = int(nids.shape[0])
    num, E = table.shape
    itemsize = jnp.dtype(table.dtype).itemsize

    # Ids handled per grid step: large enough to amortize the ~0.35us/step
    # pipeline overhead and keep the output tile sublane/lane dense, but no
    # larger than (the padded) N.
    bn = min(block_n, _round_up(max(N, 8), 8))
    n_pad = _round_up(N, bn)

    ids = jnp.clip(nids.astype(jnp.int32), 0, num - 1)
    if n_pad != N:
        ids = jnp.pad(ids, (0, n_pad - N))            # pad with valid row 0

    # VMEM budget: resident table (+ double-buffer slot) + pipelined out tiles.
    needed = 2 * num * E * itemsize + 4 * bn * E * itemsize + (1 << 20)
    vmem_limit = int(min(max(needed, 32 * 1024 * 1024), 64 * 1024 * 1024))

    out = pl.pallas_call(
        _gather_kernel,
        out_shape=jax.ShapeDtypeStruct((n_pad, E), table.dtype),
        grid_spec=pltpu.PrefetchScalarGridSpec(
            num_scalar_prefetch=1,                    # ids -> SMEM
            grid=(n_pad // bn,),
            in_specs=[
                # Full table resident in VMEM; constant block index, so it is
                # DMA'd once and reused across all grid steps.
                pl.BlockSpec((num, E), lambda i, ids_s: (0, 0)),
            ],
            out_specs=pl.BlockSpec((bn, E), lambda i, ids_s: (i, 0)),
        ),
        compiler_params=pltpu.CompilerParams(
            dimension_semantics=("parallel",),
            vmem_limit_bytes=vmem_limit,
        ),
    )(ids, table)
    return out[:N] if n_pad != N else out


class HeteroEmbedLayer:
    """JAX/Pallas port of the PyTorch HeteroEmbedLayer.

    forward(nids_dict) -> {ntype: embeds[ntype][nids]}.  All node types are
    served by one fused Pallas gather over a row-concatenated table.
    """

    def __init__(self, n_nodes_dict, embed_size, key):
        self.embed_size = embed_size
        self.n_nodes_dict = dict(n_nodes_dict)
        self.ntypes = sorted(n_nodes_dict.keys())
        self.embeds = {}
        for i, ntype in enumerate(self.ntypes):
            k = jax.random.fold_in(key, i)
            # nn.Embedding default init is N(0, 1); reproduce deterministically.
            self.embeds[ntype] = jax.random.normal(
                k, (self.n_nodes_dict[ntype], embed_size), dtype=jnp.float32
            )
        # Fused table + per-type row offsets, built once.
        self.row_offset = {}
        off = 0
        for ntype in self.ntypes:
            self.row_offset[ntype] = off
            off += self.n_nodes_dict[ntype]
        self.fused_table = jnp.concatenate(
            [self.embeds[t] for t in self.ntypes], axis=0
        )

    def __call__(self, nids_dict):
        ntypes = list(nids_dict.keys())
        parts, counts = [], []
        for ntype in ntypes:
            num = self.n_nodes_dict[ntype]
            nids = jnp.clip(nids_dict[ntype].astype(jnp.int32), 0, num - 1)
            parts.append(nids + self.row_offset[ntype])
            counts.append(int(nids.shape[0]))
        all_ids = jnp.concatenate(parts, axis=0)
        fused = embed_lookup(self.fused_table, all_ids)
        out, start = {}, 0
        for ntype, n in zip(ntypes, counts):
            out[ntype] = fused[start:start + n]
            start += n
        return out


if __name__ == "__main__":
    key = jax.random.PRNGKey(0)

    # Small heterogeneous graph setup.
    n_nodes_dict = {"paper": 40, "author": 56, "field": 24}
    embed_size = 128
    n_query = 16  # number of node ids looked up per type

    layer = HeteroEmbedLayer(n_nodes_dict, embed_size, key)

    # Deterministic query ids per node type.
    nids_dict = {}
    for i, ntype in enumerate(sorted(n_nodes_dict.keys())):
        k = jax.random.fold_in(jax.random.PRNGKey(1), i)
        nids_dict[ntype] = jax.random.randint(
            k, (n_query,), 0, n_nodes_dict[ntype], dtype=jnp.int32
        )

    out = layer(nids_dict)
    out = jax.tree_util.tree_map(jax.block_until_ready, out)

    # Verify against a plain-JAX reference gather.
    for ntype, nids in nids_dict.items():
        ref = jnp.take(layer.embeds[ntype], nids, axis=0)
        assert out[ntype].shape == (n_query, embed_size)
        assert jnp.allclose(out[ntype], ref, atol=1e-6), f"mismatch for {ntype}"

    print("KERNEL_OK")
</pallas_src>

<mosaic_0001>
module attributes {stable_mosaic.version = 11 : i64} {
  func.func @_gather_kernel(%arg0: i32, %arg1: memref<48xi32, #tpu.memory_space<smem>>, %arg2: memref<120x128xf32, #tpu.memory_space<vmem>>, %arg3: memref<48x128xf32, #tpu.memory_space<vmem>>) attributes {dimension_semantics = [#tpu.dimension_semantics<parallel>], iteration_bounds = array<i64: 1>, scalar_prefetch = 1 : i64, scratch_operands = 0 : i64, tpu.core_type = #tpu.core_type<tc>, window_params = [{pipeline_mode = #tpu.pipeline_mode<synchronous>, transform_indices = @transform_0, window_bounds = array<i64: 120, 128>}, {transform_indices = @transform_1, window_bounds = array<i64: 48, 128>}]} {
    %c48_i32 = arith.constant 48 : i32
    %0 = arith.muli %arg0, %c48_i32 : i32
    %c0_i32 = arith.constant 0 : i32
    %c48_i32_0 = arith.constant 48 : i32
    %1 = arith.addi %c0_i32, %c48_i32_0 : i32
    %c1_i32 = arith.constant 1 : i32
    scf.for %arg4 = %c0_i32 to %1 step %c1_i32  : i32 {
      %c1_i32_2 = arith.constant 1 : i32
      %2 = arith.muli %arg4, %c1_i32_2 : i32
      %c0_i32_3 = arith.constant 0 : i32
      %3 = arith.addi %c0_i32_3, %2 : i32
      %4 = arith.addi %0, %3 : i32
      %5 = arith.index_cast %4 : i32 to index
      %6 = memref.load %arg1[%5] : memref<48xi32, #tpu.memory_space<smem>>
      %7 = arith.index_cast %6 : i32 to index
      %c0 = arith.constant 0 : index
      %8 = vector.load %arg2[%7, %c0] : memref<120x128xf32, #tpu.memory_space<vmem>>, vector<1x128xf32>
      %9 = arith.index_cast %3 : i32 to index
      %c0_4 = arith.constant 0 : index
      %10 = vector.load %arg3[%9, %c0_4] : memref<48x128xf32, #tpu.memory_space<vmem>>, vector<1x128xf32>
      tpu.vector_store %arg3[%9, %c0_4], %8 {strides = array<i32>} : memref<48x128xf32, #tpu.memory_space<vmem>>, vector<1x128xf32>,
    }
    %c48_i32_1 = arith.constant 48 : i32
    return
  }
  func.func @transform_0(%arg0: i32, %arg1: memref<48xi32, #tpu.memory_space<smem>>) -> (i32, i32) {
    %c0_i32 = arith.constant 0 : i32
    %c0_i32_0 = arith.constant 0 : i32
    %c0_i32_1 = arith.constant 0 : i32
    return %c0_i32, %c0_i32_0 : i32, i32
  }
  func.func @transform_1(%arg0: i32, %arg1: memref<48xi32, #tpu.memory_space<smem>>) -> (i32, i32) {
    %c0_i32 = arith.constant 0 : i32
    %c0_i32_0 = arith.constant 0 : i32
    return %arg0, %c0_i32 : i32, i32
  }
}

</mosaic_0001>

<bundles_post_ra>
// kernel: embed_lookup.1
= control target key start
LH: loop header
LB: loop body
LE: loop exit
PB: predicated region body
PF: predicated region fallthrough
CT: control target
= control target key end

     0   :  { %s203_s0 = inlined_call_operand.vmem [shape: s32[48], index: 0, kind: input, shape index: {}]   ;;  %s204_s1 = inlined_call_operand.hbm [shape: f32[120,128], index: 1, kind: input, shape index: {}]   ;;  %s205_s2 = inlined_call_operand.hbm [shape: f32[48,128], index: 2, kind: output, shape index: {}]  }
   0x1   :  { %s7_s11 = sshll.u32 %s203_s0, 4  ;;  %s8_s11 = int_to_ptr.vmem [resolvable:$true] %s7_s11 }
   0x2   :  { %s80_s12 = scalar_lea.vmem %s8_s11, 16  ;;  %p85_p1 = scmp.lt.s32.totalorder %s8_s11, %s8_s11 }
   0x3   :  { %p81_p0 = scmp.ne.s32.totalorder %s8_s11, %s80_s12  ;;  %p86_p2 = scmp.lt.s32.totalorder %s80_s12, %s80_s12 }
   0x5   :  { %p87_p3 = por %p86_p2, %p85_p1 }
   0x7   :  { %p88_p4 = pnand %p87_p3, %p81_p0 }
   0x9   :  { %91 = shalt.err (!%p88_p4)  }
   0xa   :  { %s150_s13 = smov [#allocation3]  }
   0xb   :  { %10 = dma.vmem_to_smem %s8_s11, 16, %s150_s13, [#allocation2] }
   0xc   :  { %140 = dma.done.wait [#allocation2], 16 }
   0xd   :  { %141 = vsyncadd [#allocation2], 4294967280 }
   0xe   :  { %12 = sfence }
   0xf   :  { %13 = vsyncpa [#allocation5], 0 }
  0x10   :  { %14 = vsyncpa [#allocation6], 0  ;;  %s151_s14 = smov [#allocation4]   ;;  %s92_s17 = scalar_lea.hbm %s204_s1, 1920 }
  0x11   :  { %s20_s15 = sshll.u32 %s151_s14, 4  ;;  %p93_p5 = scmp.ne.s32.totalorder %s204_s1, %s92_s17  ;;  %s21_s15 = int_to_ptr.vmem [resolvable:$true] %s20_s15 }
  0x12   :  { %p96_p6 = scmp.lt.u32.totalorder %s92_s17, %s204_s1 }
  0x14   :  { %p98_p7 = pnand %p96_p6, %p93_p5 }
  0x16   :  { %101 = shalt.err (!%p98_p7)
}
  0x17   :  { %s102_s22 = scalar_lea.vmem %s21_s15, 1920  ;;  %p107_p9 = scmp.lt.s32.totalorder %s21_s15, %s21_s15 }
  0x18   :  { %p103_p8 = scmp.ne.s32.totalorder %s21_s15, %s102_s22  ;;  %p108_p10 = scmp.lt.s32.totalorder %s102_s22, %s102_s22 }
  0x1a   :  { %p109_p11 = por %p108_p10, %p107_p9 }
  0x1c   :  { %p110_p12 = pnand %p109_p11, %p103_p8 }
  0x1e   :  { %113 = shalt.err (!%p110_p12)
}
  0x1f   :  { %s152_s23 = smov 128   ;;  %s153_s24 = smov 8  }
  0x20   :  { %26 = dma.hbm_to_vmem [thread:$0]  %s204_s1, 1920, %s21_s15, [#allocation5], %s152_s23, %s152_s23, %s153_s24  }
  0x21   :  { %142 = dma.done.wait [#allocation5], 1920  }
  0x22   :  { %143 = vsyncadd [#allocation5], 4294965376  ;;  %s146_s27 = smov 0  }
  0x23 LB: > { %s38_s28 = sld [smem:[#allocation3 + %s148_s27]]  ;;  %s41_s30 = scalar_lea.vmem [#allocation7], %s148_s27  ;;  %s148_s27 = sphi %s146_s27, %s36_s27  }
  0x24   : > { %s36_s27 = sadd.s32 1, %s148_s27  }
  0x25   : > { %p33_p13 = scmp.ge.s32.totalorder %s36_s27, 48  }
  0x26   :  { %s154_s3 = smov (%p33_p13), [#allocation7]  }
  0x27   :  { %35 = sbr.rel (!%p33_p13) target bundleno = 35 (0x23), region = 37  ;;  %s48_s4 = sshll.u32 (%p33_p13), %s154_s3, 4  ;;  %s49_s4 = int_to_ptr.vmem [resolvable:$true] %s48_s4 }
  0x28   :  { %s114_s5 = scalar_lea.vmem (%p33_p13), %s49_s4, 768  ;;  %p119_p1 = scmp.lt.s32.totalorder (%p33_p13), %s49_s4, %s49_s4 }
  0x29   : > { %s39_s29 = scalar_lea.vmem [#allocation4], %s38_s28  ;;  %p115_p0 = scmp.ne.s32.totalorder (%p33_p13), %s49_s4, %s114_s5 }
  0x2a   : > { %v40_v0 = vld [vmem:[%s39_s29] sm:$0x1]  ;;  %p120_p2 = scmp.lt.s32.totalorder (%p33_p13), %s114_s5, %s114_s5 }
  0x2b   : > { %42 = vst [vmem:[%s41_s30] sm:$0x1] %v40_v0 }
  0x2c   :  { %p121_p3 = por (%p33_p13), %p120_p2, %p119_p1 }
  0x2e   :  { %p122_p4 = pnand %p121_p3, %p115_p0 }
  0x30   :  { %125 = shalt.err (!%p122_p4)
}
  0x31   :  { %s126_s7 = scalar_lea.hbm %s205_s2, 768 }
  0x32   :  { %p127_p5 = scmp.ne.s32.totalorder %s205_s2, %s126_s7  ;;  %p130_p6 = scmp.lt.u32.totalorder %s126_s7, %s205_s2 }
  0x34   :  { %p132_p7 = pnand %p130_p6, %p127_p5 }
  0x36   :  { %135 = shalt.err (!%p132_p7)
}
  0x37   :  { %54 = dma.vmem_to_hbm [thread:$0]  %s49_s4, 768, %s205_s2, [#allocation6], %s152_s23, %s152_s23, %s153_s24  }
  0x38   :  { %144 = dma.done.wait [#allocation6], 768  }
  0x39   :  { %145 = vsyncadd [#allocation6], 4294966528 }
  0x3a   :  { %58 = vsyncpa [#allocation5], 1 }
  0x3b   :  { %59 = vsyncpa [#allocation6], 1 }

</bundles_post_ra>
